<compile_context>
chip_gen: v6e
topology: v6e:2x2x1
jax: 0.10.0
libtpu: 0.0.40
codegen_flags: <defaults>
</compile_context>

<pallas_src>
import functools

import jax
import jax.numpy as jnp
from jax.experimental import pallas as pl
from jax.experimental.pallas import tpu as pltpu


def _minus_kernel(x_ref, o_ref):
    # Pure VPU elementwise op: subtract an immediate scalar constant.
    o_ref[...] = x_ref[...] - jnp.asarray(1, dtype=o_ref.dtype)


def _sublane_multiple(dtype):
    # Sub-32-bit dtypes pack 2/4 rows per sublane; keep block row counts
    # aligned to the packed-vreg height so stores stay unmasked.
    itemsize = jnp.dtype(dtype).itemsize
    if itemsize >= 4:
        return 8
    if itemsize == 2:
        return 16
    return 32


@functools.lru_cache(maxsize=None)
def _target_block_bytes():
    """Per-generation block size.

    4 live buffers (double-buffered input + output) are capped at ~3/8 of
    physical VMEM: ~8 MiB blocks on v5e/v6e (128 MiB), ~6 MiB on v7x (64 MiB).
    Falls back to a v7x-safe value if the hardware query is unavailable.
    """
    vmem = None
    try:
        vmem = getattr(pltpu.get_tpu_info(), "vmem_capacity_bytes", None)
    except Exception:  # pragma: no cover - defensive, query is best-effort
        vmem = None
    if not vmem:
        vmem = 64 << 20  # conservative: v7x physical VMEM per TensorCore
    return int(min(8 << 20, max(2 << 20, (vmem * 3 // 8) // 4)))


def _pallas_minus_2d(x2d, block_rows):
    rows, lanes = x2d.shape
    itemsize = jnp.dtype(x2d.dtype).itemsize
    blk_bytes = block_rows * lanes * itemsize
    # 4 live buffers + headroom; keep below v7x physical VMEM (64 MiB).
    vmem_limit = int(min(56 << 20, max(32 << 20, 4 * blk_bytes + (8 << 20))))
    return pl.pallas_call(
        _minus_kernel,
        out_shape=jax.ShapeDtypeStruct((rows, lanes), x2d.dtype),
        grid_spec=pltpu.PrefetchScalarGridSpec(
            num_scalar_prefetch=0,
            grid=(pl.cdiv(rows, block_rows),),
            in_specs=[pl.BlockSpec((block_rows, lanes), lambda i: (i, 0))],
            out_specs=pl.BlockSpec((block_rows, lanes), lambda i: (i, 0)),
        ),
        compiler_params=pltpu.CompilerParams(
            # Single streaming axis; "parallel" lets the grid shard across the
            # 2 TensorCores on v7x (no-op on v5e/v6e). Default Buffered(2)
            # pipelining is kept (streaming multi-MiB blocks is fully hidden).
            dimension_semantics=("parallel",),
            vmem_limit_bytes=vmem_limit,
        ),
    )(x2d)


def _minus_impl(x, force_pallas):
    dtype = x.dtype
    n = x.size
    itemsize = jnp.dtype(dtype).itemsize
    block_bytes = _target_block_bytes()

    # Widest lane-dense layout that divides the flat size exactly (no padding).
    lanes = None
    for w in (1024, 512, 256, 128):
        if n % w == 0:
            lanes = w
            break

    # Fused-XLA path: ragged sizes (avoids the pad + slice extra HBM passes),
    # empty arrays, and anything smaller than 2 full blocks (a 1-step Pallas
    # grid has no pipelining / megacore benefit and only pays launch cost).
    if lanes is None or n == 0 or (
        not force_pallas and n * itemsize < 2 * block_bytes
    ):
        return x - jnp.asarray(1, dtype=dtype)

    rows = n // lanes
    sl = _sublane_multiple(dtype)
    target_rows = max(sl, (block_bytes // (lanes * itemsize)) // sl * sl)

    if rows <= sl:
        block_rows = rows  # single full-extent block (always legal)
    else:
        # Guarantee >= 2 grid steps so double-buffering and v7x megacore
        # sharding engage; otherwise use the biggest generation-safe block.
        half_rows = -(-((rows + 1) // 2) // sl) * sl
        block_rows = max(sl, min(target_rows, half_rows))

    x2d = jnp.reshape(x, (rows, lanes))
    y2d = _pallas_minus_2d(x2d, block_rows)
    return jnp.reshape(y2d, x.shape)


_minus_jitted = jax.jit(_minus_impl, static_argnums=(1,))


def minus(x, *, force_pallas=False):
    """y = x - ones_like(x) (PyTorch `Minus.forward`).

    jit-wrapped so the lane-dense reshapes around the kernel are
    metadata-only and the whole op stays at the 2N-byte HBM roofline.
    """
    return _minus_jitted(x, force_pallas)


if __name__ == "__main__":
    key = jax.random.PRNGKey(0)
    k0, k1, k2, k3 = jax.random.split(key, 4)

    # Primary small NCHW input (force the Pallas path despite the small size).
    x = jax.random.normal(k0, (2, 4, 16, 16), dtype=jnp.float32)
    y = minus(x, force_pallas=True)
    jax.block_until_ready(y)
    assert y.shape == x.shape and y.dtype == x.dtype
    assert jnp.array_equal(y, x - jnp.ones_like(x))

    # Ragged size (n % 128 != 0): dispatches to fused XLA (no pad/slice passes).
    x_odd = jax.random.normal(k1, (3, 5, 7, 11), dtype=jnp.float32)
    y_odd = minus(x_odd, force_pallas=True)
    jax.block_until_ready(y_odd)
    assert jnp.array_equal(y_odd, x_odd - jnp.ones_like(x_odd))

    # bf16 input: exercises the dtype-aware sublane packing and dtype handling.
    x_bf = jax.random.normal(k2, (2, 4, 16, 16), dtype=jnp.bfloat16)
    y_bf = minus(x_bf, force_pallas=True)
    jax.block_until_ready(y_bf)
    assert y_bf.dtype == jnp.bfloat16
    assert jnp.array_equal(y_bf, x_bf - jnp.ones_like(x_bf))

    # Multi-step grid with a masked partial boundary block (forced Pallas path).
    x_multi = jax.random.normal(k3, (2, 12, 32, 32), dtype=jnp.float32)
    y_multi = minus(x_multi, force_pallas=True)
    jax.block_until_ready(y_multi)
    assert jnp.array_equal(y_multi, x_multi - jnp.ones_like(x_multi))

    print("KERNEL_OK")
</pallas_src>

<mosaic_0001>
module attributes {stable_mosaic.version = 11 : i64} {
  func.func @_minus_kernel(%arg0: i32, %arg1: memref<2x1024xf32, #tpu.memory_space<vmem>>, %arg2: memref<2x1024xf32, #tpu.memory_space<vmem>>) attributes {dimension_semantics = [#tpu.dimension_semantics<parallel>], iteration_bounds = array<i64: 1>, scalar_prefetch = 0 : i64, scratch_operands = 0 : i64, tpu.core_type = #tpu.core_type<tc>, window_params = [{transform_indices = @transform_0, window_bounds = array<i64: 2, 1024>}, {transform_indices = @transform_1, window_bounds = array<i64: 2, 1024>}]} {
    %c0 = arith.constant 0 : index
    %c0_0 = arith.constant 0 : index
    %0 = vector.load %arg1[%c0, %c0_0] : memref<2x1024xf32, #tpu.memory_space<vmem>>, vector<2x1024xf32>
    %cst = arith.constant 1.000000e+00 : f32
    %1 = vector.broadcast %cst : f32 to vector<2x1024xf32>
    %2 = arith.subf %0, %1 : vector<2x1024xf32>
    %c0_1 = arith.constant 0 : index
    %c0_2 = arith.constant 0 : index
    %3 = vector.load %arg2[%c0_1, %c0_2] : memref<2x1024xf32, #tpu.memory_space<vmem>>, vector<2x1024xf32>
    tpu.vector_store %arg2[%c0_1, %c0_2], %2 {strides = array<i32>} : memref<2x1024xf32, #tpu.memory_space<vmem>>, vector<2x1024xf32>,
    return
  }
  func.func @transform_0(%arg0: i32) -> (i32, i32) {
    %c0_i32 = arith.constant 0 : i32
    %c0_i32_0 = arith.constant 0 : i32
    return %arg0, %c0_i32 : i32, i32
  }
  func.func @transform_1(%arg0: i32) -> (i32, i32) {
    %c0_i32 = arith.constant 0 : i32
    %c0_i32_0 = arith.constant 0 : i32
    return %arg0, %c0_i32 : i32, i32
  }
}

</mosaic_0001>

<bundles_post_ra>
// kernel: _minus_impl.1
= control target key start
LH: loop header
LB: loop body
LE: loop exit
PB: predicated region body
PF: predicated region fallthrough
CT: control target
= control target key end

     0   :  { %s42_s0 = inlined_call_operand.vmem [shape: f32[2,1024], index: 0, kind: input, shape index: {}]   ;;  %s43_s1 = inlined_call_operand.vmem [shape: f32[2,1024], index: 1, kind: output, shape index: {}]  }
   0x1   :  { %v8_v0 = vld [vmem:[%s42_s0] sm:$0xff]  ;;  %v9_v1 = vld [vmem:[%s42_s0 + $0x8] sm:$0xff] }
   0x2   :  { %v18_v2 = vadd.f32 -1.0, %v8_v0  ;;  %v19_v3 = vadd.f32 -1.0, %v9_v1 }
   0x4   :  { %12 = vst [vmem:[%s43_s1] sm:$0xff] %v18_v2  ;;  %13 = vst [vmem:[%s43_s1 + $0x8] sm:$0xff] %v19_v3 }

</bundles_post_ra>
